<compile_context>
chip_gen: v7x
topology: tpu7x:2x2x1
jax: 0.10.0
libtpu: 0.0.40
codegen_flags: <defaults>
</compile_context>

<pallas_src>
import functools
import math

import jax
import jax.numpy as jnp
from jax import lax
from jax.experimental import pallas as pl
from jax.experimental.pallas import tpu as pltpu


def _round_up(a, b):
    return ((a + b - 1) // b) * b


def _upsample_conv_kernel(xp_ref, w_ref, b_ref, o_ref, *, n_taps, offs, lph):
    """One grid step = one batch element, all four output phases.

    xp_ref: (1, C, lp_in)          zero-padded, spatially-flattened input x
    w_ref : (4*n_taps, n_out, C)   collapsed per-phase / per-tap weight matrices
    b_ref : (n_out, 1)             bias (out-channels on sublanes)
    o_ref : (1, 4, n_out, lph)     four flattened phase planes (row stride wp2)
    """
    n_out = w_ref.shape[1]
    bias = b_ref[...]
    # Each phase is ((k+1)/2)^2 shifted matmuls: with x flattened at row stride
    # wp2, a tap is a 1-D slice of the same VMEM buffer at a static offset (the
    # horizontal-pad columns absorb the row wrap-around and are sliced off by
    # the wrapper).
    for ph in range(4):
        acc = jnp.zeros((n_out, lph), dtype=jnp.float32)
        for t in range(n_taps):
            off = offs[ph * n_taps + t]             # static python int
            u_t = xp_ref[0, :, pl.ds(off, lph)]     # (C, lph)
            acc = acc + jnp.dot(w_ref[ph * n_taps + t], u_t,
                                preferred_element_type=jnp.float32)
        o_ref[0, ph, :, :] = (acc + bias).astype(o_ref.dtype)


@jax.jit
def upsample_conv(x, weight, bias):
    """UpSampleConv forward.

    x:      (N, C, H, W)        float32 (NCHW)
    weight: (n_out, C, kh, kw)  float32
    bias:   (n_out,)            float32
    returns (N, n_out, 2H, 2W)  float32
    """
    n, c_in, h, w = x.shape
    n_out, c_w, kh, kw = weight.shape
    assert c_w == c_in
    assert kh == kw and kh % 2 == 1, "odd kernel size expected (same-padding conv)"
    p = (kh - 1) // 2
    p2 = (p + 1) // 2            # ceil(p/2): spatial halo needed on the ORIGINAL x
    kk = p + 1                   # collapsed per-phase kernel extent
    wp2 = w + 2 * p2             # padded-x row stride
    hp2 = h + 2 * p2

    # ---- polyphase decomposition of (nearest-2x upsample -> conv) ----
    # For output phase dy (resp. dx): original tap ki reads source row
    # y + floor((dy + ki - p) / 2); taps with equal source offsets are summed.
    amins = [(d - p) // 2 for d in (0, 1)]
    rmaps = [[(d + kidx - p) // 2 - amins[d] for kidx in range(kh)] for d in (0, 1)]

    taps, offs = [], []
    for dy in (0, 1):
        for dx in (0, 1):
            ro = amins[dy] + p2            # base row offset into padded x
            co = amins[dx] + p2            # base col offset into padded x
            for a in range(kk):
                for b in range(kk):
                    wsum = jnp.zeros((n_out, c_in), weight.dtype)
                    for ki in range(kh):
                        if rmaps[0 + dy][ki] != a:
                            continue
                        for kj in range(kw):
                            if rmaps[0 + dx][kj] != b:
                                continue
                            wsum = wsum + weight[:, :, ki, kj]
                    taps.append(wsum)
                    offs.append((ro + a) * wp2 + (co + b))
    w_taps = jnp.stack(taps, axis=0)        # (4*kk*kk, n_out, C)
    b2d = bias.reshape(n_out, 1)
    n_taps = kk * kk
    offs = tuple(offs)

    # ---- flattened, zero-padded input (row stride wp2) ----
    lph = _round_up(h * wp2, 128)                      # lane-dense phase planes
    max_off = 2 * p2 * wp2 + 2 * p2                    # largest tap offset
    lp_in = _round_up(max_off + lph, 128)
    xp = jnp.pad(x, ((0, 0), (0, 0), (p2, p2), (p2, p2)))
    xpf = xp.reshape(n, c_in, hp2 * wp2)
    xpf = jnp.pad(xpf, ((0, 0), (0, 0), (0, lp_in - hp2 * wp2)))

    kernel = functools.partial(_upsample_conv_kernel,
                               n_taps=n_taps, offs=offs, lph=lph)

    out_f = pl.pallas_call(
        kernel,
        out_shape=jax.ShapeDtypeStruct((n, 4, n_out, lph), x.dtype),
        grid_spec=pltpu.PrefetchScalarGridSpec(
            num_scalar_prefetch=0,
            grid=(n,),                                 # 2 parallel steps (v7x: 2 TCs)
            in_specs=[
                pl.BlockSpec((1, c_in, lp_in), lambda i: (i, 0, 0)),          # x slab
                pl.BlockSpec((4 * n_taps, n_out, c_in), lambda i: (0, 0, 0)),  # weights
                pl.BlockSpec((n_out, 1), lambda i: (0, 0)),                    # bias
            ],
            out_specs=pl.BlockSpec((1, 4, n_out, lph), lambda i: (i, 0, 0, 0)),
        ),
        compiler_params=pltpu.CompilerParams(
            dimension_semantics=("parallel",),
            vmem_limit_bytes=32 * 1024 * 1024,
        ),
    )(xpf, w_taps, b2d)

    # ---- un-flatten phase planes and interleave to (N, n_out, 2H, 2W) ----
    out = out_f[:, :, :, : h * wp2].reshape(n, 2, 2, n_out, h, wp2)[..., :w]
    out = jnp.transpose(out, (0, 3, 4, 1, 5, 2)).reshape(n, n_out, 2 * h, 2 * w)
    return out


# ------------------------- pure-JAX reference (literal port) -------------------------

def _depth_to_space_ref(x, block):
    b, c, h, w = x.shape
    out = jnp.transpose(x, (0, 2, 3, 1))                      # NHWC
    od = c // (block * block)
    t1 = out.reshape(b, h, w, block * block, od)
    spl = jnp.split(t1, block, axis=3)                        # chunks of size `block`
    stacks = [t.reshape(b, h, w * block, od) for t in spl]
    out = jnp.stack(stacks, axis=0)                           # (block, B, H, W*block, od)
    out = jnp.swapaxes(out, 0, 1)                             # transpose(0, 1)
    out = jnp.transpose(out, (0, 2, 1, 3, 4))                 # permute(0, 2, 1, 3, 4)
    out = out.reshape(b, h * block, w * block, od)
    return jnp.transpose(out, (0, 3, 1, 2))                   # back to NCHW


def _reference(x, weight, bias):
    xc = jnp.concatenate([x, x, x, x], axis=1)
    u = _depth_to_space_ref(xc, 2)
    p = (weight.shape[2] - 1) // 2
    y = lax.conv_general_dilated(
        u, weight, window_strides=(1, 1),
        padding=((p, p), (p, p)),
        dimension_numbers=("NCHW", "OIHW", "NCHW"),
    )
    return y + bias.reshape(1, -1, 1, 1)


if __name__ == "__main__":
    # UpSampleConv(input_dim=4, output_dim=8, kernel_size=3, bias=True)
    input_dim, output_dim, ksize = 4, 8, 3
    N, H, W = 2, 16, 16

    key = jax.random.PRNGKey(0)
    kx, kw_, kb = jax.random.split(key, 3)
    x = jax.random.normal(kx, (N, input_dim, H, W), dtype=jnp.float32)
    weight = 0.02 * jax.random.normal(
        kw_, (output_dim, input_dim, ksize, ksize), dtype=jnp.float32)
    bound = 1.0 / math.sqrt(input_dim * ksize * ksize)
    bias = jax.random.uniform(kb, (output_dim,), minval=-bound, maxval=bound,
                              dtype=jnp.float32)

    out = upsample_conv(x, weight, bias)
    out = jax.block_until_ready(out)

    ref = _reference(x, weight, bias)
    assert out.shape == (N, output_dim, 2 * H, 2 * W), out.shape
    max_err = float(jnp.max(jnp.abs(out - ref)))
    assert jnp.allclose(out, ref, atol=1e-4, rtol=1e-4), max_err

    print("KERNEL_OK")
</pallas_src>

<mosaic_0001>
module attributes {stable_mosaic.version = 11 : i64} {
  func.func @_upsample_conv_kernel(%arg0: i32, %arg1: memref<1x4x512xf32, #tpu.memory_space<vmem>>, %arg2: memref<16x8x4xf32, #tpu.memory_space<vmem>>, %arg3: memref<8x1xf32, #tpu.memory_space<vmem>>, %arg4: memref<1x4x8x384xf32, #tpu.memory_space<vmem>>) attributes {dimension_semantics = [#tpu.dimension_semantics<parallel>], iteration_bounds = array<i64: 2>, scalar_prefetch = 0 : i64, scratch_operands = 0 : i64, tpu.core_type = #tpu.core_type<tc>, window_params = [{transform_indices = @transform_0, window_bounds = array<i64: 1, 4, 512>}, {pipeline_mode = #tpu.pipeline_mode<synchronous>, transform_indices = @transform_1, window_bounds = array<i64: 16, 8, 4>}, {pipeline_mode = #tpu.pipeline_mode<synchronous>, transform_indices = @transform_2, window_bounds = array<i64: 8, 1>}, {transform_indices = @transform_3, window_bounds = array<i64: 1, 4, 8, 384>}]} {
    %c0 = arith.constant 0 : index
    %c0_0 = arith.constant 0 : index
    %0 = vector.load %arg3[%c0, %c0_0] : memref<8x1xf32, #tpu.memory_space<vmem>>, vector<8x1xf32>
    %cst = arith.constant 0.000000e+00 : f32
    %1 = vector.broadcast %cst : f32 to vector<8x384xf32>
    %c0_1 = arith.constant 0 : index
    %c0_2 = arith.constant 0 : index
    %c0_3 = arith.constant 0 : index
    %2 = vector.load %arg1[%c0_1, %c0_2, %c0_3] : memref<1x4x512xf32, #tpu.memory_space<vmem>>, vector<1x4x384xf32>
    %3 = vector.shape_cast %2 : vector<1x4x384xf32> to vector<4x384xf32>
    %c0_4 = arith.constant 0 : index
    %c0_5 = arith.constant 0 : index
    %c0_6 = arith.constant 0 : index
    %4 = vector.load %arg2[%c0_4, %c0_5, %c0_6] : memref<16x8x4xf32, #tpu.memory_space<vmem>>, vector<1x8x4xf32>
    %5 = vector.shape_cast %4 : vector<1x8x4xf32> to vector<8x4xf32>
    %cst_7 = arith.constant dense<0.000000e+00> : vector<8x384xf32>
    %6 = tpu.matmul %5, %3, %cst_7 {dimension_numbers = #tpu.dot_dimension_numbers<[1], [0], [0], [1], [0, 0, 1, 1], [], []>} : vector<8x4xf32>, vector<4x384xf32>, vector<8x384xf32> -> vector<8x384xf32>
    %7 = arith.addf %1, %6 : vector<8x384xf32>
    %c0_8 = arith.constant 0 : index
    %c0_9 = arith.constant 0 : index
    %c1 = arith.constant 1 : index
    %8 = vector.load %arg1[%c0_8, %c0_9, %c1] : memref<1x4x512xf32, #tpu.memory_space<vmem>>, vector<1x4x384xf32>
    %9 = vector.shape_cast %8 : vector<1x4x384xf32> to vector<4x384xf32>
    %c1_10 = arith.constant 1 : index
    %c0_11 = arith.constant 0 : index
    %c0_12 = arith.constant 0 : index
    %10 = vector.load %arg2[%c1_10, %c0_11, %c0_12] : memref<16x8x4xf32, #tpu.memory_space<vmem>>, vector<1x8x4xf32>
    %11 = vector.shape_cast %10 : vector<1x8x4xf32> to vector<8x4xf32>
    %cst_13 = arith.constant dense<0.000000e+00> : vector<8x384xf32>
    %12 = tpu.matmul %11, %9, %cst_13 {dimension_numbers = #tpu.dot_dimension_numbers<[1], [0], [0], [1], [0, 0, 1, 1], [], []>} : vector<8x4xf32>, vector<4x384xf32>, vector<8x384xf32> -> vector<8x384xf32>
    %13 = arith.addf %7, %12 : vector<8x384xf32>
    %c0_14 = arith.constant 0 : index
    %c0_15 = arith.constant 0 : index
    %c18 = arith.constant 18 : index
    %14 = vector.load %arg1[%c0_14, %c0_15, %c18] : memref<1x4x512xf32, #tpu.memory_space<vmem>>, vector<1x4x384xf32>
    %15 = vector.shape_cast %14 : vector<1x4x384xf32> to vector<4x384xf32>
    %c2 = arith.constant 2 : index
    %c0_16 = arith.constant 0 : index
    %c0_17 = arith.constant 0 : index
    %16 = vector.load %arg2[%c2, %c0_16, %c0_17] : memref<16x8x4xf32, #tpu.memory_space<vmem>>, vector<1x8x4xf32>
    %17 = vector.shape_cast %16 : vector<1x8x4xf32> to vector<8x4xf32>
    %cst_18 = arith.constant dense<0.000000e+00> : vector<8x384xf32>
    %18 = tpu.matmul %17, %15, %cst_18 {dimension_numbers = #tpu.dot_dimension_numbers<[1], [0], [0], [1], [0, 0, 1, 1], [], []>} : vector<8x4xf32>, vector<4x384xf32>, vector<8x384xf32> -> vector<8x384xf32>
    %19 = arith.addf %13, %18 : vector<8x384xf32>
    %c0_19 = arith.constant 0 : index
    %c0_20 = arith.constant 0 : index
    %c19 = arith.constant 19 : index
    %20 = vector.load %arg1[%c0_19, %c0_20, %c19] : memref<1x4x512xf32, #tpu.memory_space<vmem>>, vector<1x4x384xf32>
    %21 = vector.shape_cast %20 : vector<1x4x384xf32> to vector<4x384xf32>
    %c3 = arith.constant 3 : index
    %c0_21 = arith.constant 0 : index
    %c0_22 = arith.constant 0 : index
    %22 = vector.load %arg2[%c3, %c0_21, %c0_22] : memref<16x8x4xf32, #tpu.memory_space<vmem>>, vector<1x8x4xf32>
    %23 = vector.shape_cast %22 : vector<1x8x4xf32> to vector<8x4xf32>
    %cst_23 = arith.constant dense<0.000000e+00> : vector<8x384xf32>
    %24 = tpu.matmul %23, %21, %cst_23 {dimension_numbers = #tpu.dot_dimension_numbers<[1], [0], [0], [1], [0, 0, 1, 1], [], []>} : vector<8x4xf32>, vector<4x384xf32>, vector<8x384xf32> -> vector<8x384xf32>
    %25 = arith.addf %19, %24 : vector<8x384xf32>
    %26 = vector.broadcast %0 : vector<8x1xf32> to vector<8x384xf32>
    %27 = arith.addf %25, %26 : vector<8x384xf32>
    %c0_24 = arith.constant 0 : index
    %c0_25 = arith.constant 0 : index
    %c0_26 = arith.constant 0 : index
    %c0_27 = arith.constant 0 : index
    %28 = vector.load %arg4[%c0_24, %c0_25, %c0_26, %c0_27] : memref<1x4x8x384xf32, #tpu.memory_space<vmem>>, vector<1x1x8x384xf32>
    %29 = vector.shape_cast %28 : vector<1x1x8x384xf32> to vector<8x384xf32>
    %30 = vector.shape_cast %27 : vector<8x384xf32> to vector<1x1x8x384xf32>
    tpu.vector_store %arg4[%c0_24, %c0_25, %c0_26, %c0_27], %30 {strides = array<i32>} : memref<1x4x8x384xf32, #tpu.memory_space<vmem>>, vector<1x1x8x384xf32>,
    %cst_28 = arith.constant 0.000000e+00 : f32
    %31 = vector.broadcast %cst_28 : f32 to vector<8x384xf32>
    %c0_29 = arith.constant 0 : index
    %c0_30 = arith.constant 0 : index
    %c1_31 = arith.constant 1 : index
    %32 = vector.load %arg1[%c0_29, %c0_30, %c1_31] : memref<1x4x512xf32, #tpu.memory_space<vmem>>, vector<1x4x384xf32>
    %33 = vector.shape_cast %32 : vector<1x4x384xf32> to vector<4x384xf32>
    %c4 = arith.constant 4 : index
    %c0_32 = arith.constant 0 : index
    %c0_33 = arith.constant 0 : index
    %34 = vector.load %arg2[%c4, %c0_32, %c0_33] : memref<16x8x4xf32, #tpu.memory_space<vmem>>, vector<1x8x4xf32>
    %35 = vector.shape_cast %34 : vector<1x8x4xf32> to vector<8x4xf32>
    %cst_34 = arith.constant dense<0.000000e+00> : vector<8x384xf32>
    %36 = tpu.matmul %35, %33, %cst_34 {dimension_numbers = #tpu.dot_dimension_numbers<[1], [0], [0], [1], [0, 0, 1, 1], [], []>} : vector<8x4xf32>, vector<4x384xf32>, vector<8x384xf32> -> vector<8x384xf32>
    %37 = arith.addf %31, %36 : vector<8x384xf32>
    %c0_35 = arith.constant 0 : index
    %c0_36 = arith.constant 0 : index
    %c2_37 = arith.constant 2 : index
    %38 = vector.load %arg1[%c0_35, %c0_36, %c2_37] : memref<1x4x512xf32, #tpu.memory_space<vmem>>, vector<1x4x384xf32>
    %39 = vector.shape_cast %38 : vector<1x4x384xf32> to vector<4x384xf32>
    %c5 = arith.constant 5 : index
    %c0_38 = arith.constant 0 : index
    %c0_39 = arith.constant 0 : index
    %40 = vector.load %arg2[%c5, %c0_38, %c0_39] : memref<16x8x4xf32, #tpu.memory_space<vmem>>, vector<1x8x4xf32>
    %41 = vector.shape_cast %40 : vector<1x8x4xf32> to vector<8x4xf32>
    %cst_40 = arith.constant dense<0.000000e+00> : vector<8x384xf32>
    %42 = tpu.matmul %41, %39, %cst_40 {dimension_numbers = #tpu.dot_dimension_numbers<[1], [0], [0], [1], [0, 0, 1, 1], [], []>} : vector<8x4xf32>, vector<4x384xf32>, vector<8x384xf32> -> vector<8x384xf32>
    %43 = arith.addf %37, %42 : vector<8x384xf32>
    %c0_41 = arith.constant 0 : index
    %c0_42 = arith.constant 0 : index
    %c19_43 = arith.constant 19 : index
    %44 = vector.load %arg1[%c0_41, %c0_42, %c19_43] : memref<1x4x512xf32, #tpu.memory_space<vmem>>, vector<1x4x384xf32>
    %45 = vector.shape_cast %44 : vector<1x4x384xf32> to vector<4x384xf32>
    %c6 = arith.constant 6 : index
    %c0_44 = arith.constant 0 : index
    %c0_45 = arith.constant 0 : index
    %46 = vector.load %arg2[%c6, %c0_44, %c0_45] : memref<16x8x4xf32, #tpu.memory_space<vmem>>, vector<1x8x4xf32>
    %47 = vector.shape_cast %46 : vector<1x8x4xf32> to vector<8x4xf32>
    %cst_46 = arith.constant dense<0.000000e+00> : vector<8x384xf32>
    %48 = tpu.matmul %47, %45, %cst_46 {dimension_numbers = #tpu.dot_dimension_numbers<[1], [0], [0], [1], [0, 0, 1, 1], [], []>} : vector<8x4xf32>, vector<4x384xf32>, vector<8x384xf32> -> vector<8x384xf32>
    %49 = arith.addf %43, %48 : vector<8x384xf32>
    %c0_47 = arith.constant 0 : index
    %c0_48 = arith.constant 0 : index
    %c20 = arith.constant 20 : index
    %50 = vector.load %arg1[%c0_47, %c0_48, %c20] : memref<1x4x512xf32, #tpu.memory_space<vmem>>, vector<1x4x384xf32>
    %51 = vector.shape_cast %50 : vector<1x4x384xf32> to vector<4x384xf32>
    %c7 = arith.constant 7 : index
    %c0_49 = arith.constant 0 : index
    %c0_50 = arith.constant 0 : index
    %52 = vector.load %arg2[%c7, %c0_49, %c0_50] : memref<16x8x4xf32, #tpu.memory_space<vmem>>, vector<1x8x4xf32>
    %53 = vector.shape_cast %52 : vector<1x8x4xf32> to vector<8x4xf32>
    %cst_51 = arith.constant dense<0.000000e+00> : vector<8x384xf32>
    %54 = tpu.matmul %53, %51, %cst_51 {dimension_numbers = #tpu.dot_dimension_numbers<[1], [0], [0], [1], [0, 0, 1, 1], [], []>} : vector<8x4xf32>, vector<4x384xf32>, vector<8x384xf32> -> vector<8x384xf32>
    %55 = arith.addf %49, %54 : vector<8x384xf32>
    %56 = vector.broadcast %0 : vector<8x1xf32> to vector<8x384xf32>
    %57 = arith.addf %55, %56 : vector<8x384xf32>
    %c0_52 = arith.constant 0 : index
    %c1_53 = arith.constant 1 : index
    %c0_54 = arith.constant 0 : index
    %c0_55 = arith.constant 0 : index
    %58 = vector.load %arg4[%c0_52, %c1_53, %c0_54, %c0_55] : memref<1x4x8x384xf32, #tpu.memory_space<vmem>>, vector<1x1x8x384xf32>
    %59 = vector.shape_cast %58 : vector<1x1x8x384xf32> to vector<8x384xf32>
    %60 = vector.shape_cast %57 : vector<8x384xf32> to vector<1x1x8x384xf32>
    tpu.vector_store %arg4[%c0_52, %c1_53, %c0_54, %c0_55], %60 {strides = array<i32>} : memref<1x4x8x384xf32, #tpu.memory_space<vmem>>, vector<1x1x8x384xf32>,
    %cst_56 = arith.constant 0.000000e+00 : f32
    %61 = vector.broadcast %cst_56 : f32 to vector<8x384xf32>
    %c0_57 = arith.constant 0 : index
    %c0_58 = arith.constant 0 : index
    %c18_59 = arith.constant 18 : index
    %62 = vector.load %arg1[%c0_57, %c0_58, %c18_59] : memref<1x4x512xf32, #tpu.memory_space<vmem>>, vector<1x4x384xf32>
    %63 = vector.shape_cast %62 : vector<1x4x384xf32> to vector<4x384xf32>
    %c8 = arith.constant 8 : index
    %c0_60 = arith.constant 0 : index
    %c0_61 = arith.constant 0 : index
    %64 = vector.load %arg2[%c8, %c0_60, %c0_61] : memref<16x8x4xf32, #tpu.memory_space<vmem>>, vector<1x8x4xf32>
    %65 = vector.shape_cast %64 : vector<1x8x4xf32> to vector<8x4xf32>
    %cst_62 = arith.constant dense<0.000000e+00> : vector<8x384xf32>
    %66 = tpu.matmul %65, %63, %cst_62 {dimension_numbers = #tpu.dot_dimension_numbers<[1], [0], [0], [1], [0, 0, 1, 1], [], []>} : vector<8x4xf32>, vector<4x384xf32>, vector<8x384xf32> -> vector<8x384xf32>
    %67 = arith.addf %61, %66 : vector<8x384xf32>
    %c0_63 = arith.constant 0 : index
    %c0_64 = arith.constant 0 : index
    %c19_65 = arith.constant 19 : index
    %68 = vector.load %arg1[%c0_63, %c0_64, %c19_65] : memref<1x4x512xf32, #tpu.memory_space<vmem>>, vector<1x4x384xf32>
    %69 = vector.shape_cast %68 : vector<1x4x384xf32> to vector<4x384xf32>
    %c9 = arith.constant 9 : index
    %c0_66 = arith.constant 0 : index
    %c0_67 = arith.constant 0 : index
    %70 = vector.load %arg2[%c9, %c0_66, %c0_67] : memref<16x8x4xf32, #tpu.memory_space<vmem>>, vector<1x8x4xf32>
    %71 = vector.shape_cast %70 : vector<1x8x4xf32> to vector<8x4xf32>
    %cst_68 = arith.constant dense<0.000000e+00> : vector<8x384xf32>
    %72 = tpu.matmul %71, %69, %cst_68 {dimension_numbers = #tpu.dot_dimension_numbers<[1], [0], [0], [1], [0, 0, 1, 1], [], []>} : vector<8x4xf32>, vector<4x384xf32>, vector<8x384xf32> -> vector<8x384xf32>
    %73 = arith.addf %67, %72 : vector<8x384xf32>
    %c0_69 = arith.constant 0 : index
    %c0_70 = arith.constant 0 : index
    %c36 = arith.constant 36 : index
    %74 = vector.load %arg1[%c0_69, %c0_70, %c36] : memref<1x4x512xf32, #tpu.memory_space<vmem>>, vector<1x4x384xf32>
    %75 = vector.shape_cast %74 : vector<1x4x384xf32> to vector<4x384xf32>
    %c10 = arith.constant 10 : index
    %c0_71 = arith.constant 0 : index
    %c0_72 = arith.constant 0 : index
    %76 = vector.load %arg2[%c10, %c0_71, %c0_72] : memref<16x8x4xf32, #tpu.memory_space<vmem>>, vector<1x8x4xf32>
    %77 = vector.shape_cast %76 : vector<1x8x4xf32> to vector<8x4xf32>
    %cst_73 = arith.constant dense<0.000000e+00> : vector<8x384xf32>
    %78 = tpu.matmul %77, %75, %cst_73 {dimension_numbers = #tpu.dot_dimension_numbers<[1], [0], [0], [1], [0, 0, 1, 1], [], []>} : vector<8x4xf32>, vector<4x384xf32>, vector<8x384xf32> -> vector<8x384xf32>
    %79 = arith.addf %73, %78 : vector<8x384xf32>
    %c0_74 = arith.constant 0 : index
    %c0_75 = arith.constant 0 : index
    %c37 = arith.constant 37 : index
    %80 = vector.load %arg1[%c0_74, %c0_75, %c37] : memref<1x4x512xf32, #tpu.memory_space<vmem>>, vector<1x4x384xf32>
    %81 = vector.shape_cast %80 : vector<1x4x384xf32> to vector<4x384xf32>
    %c11 = arith.constant 11 : index
    %c0_76 = arith.constant 0 : index
    %c0_77 = arith.constant 0 : index
    %82 = vector.load %arg2[%c11, %c0_76, %c0_77] : memref<16x8x4xf32, #tpu.memory_space<vmem>>, vector<1x8x4xf32>
    %83 = vector.shape_cast %82 : vector<1x8x4xf32> to vector<8x4xf32>
    %cst_78 = arith.constant dense<0.000000e+00> : vector<8x384xf32>
    %84 = tpu.matmul %83, %81, %cst_78 {dimension_numbers = #tpu.dot_dimension_numbers<[1], [0], [0], [1], [0, 0, 1, 1], [], []>} : vector<8x4xf32>, vector<4x384xf32>, vector<8x384xf32> -> vector<8x384xf32>
    %85 = arith.addf %79, %84 : vector<8x384xf32>
    %86 = vector.broadcast %0 : vector<8x1xf32> to vector<8x384xf32>
    %87 = arith.addf %85, %86 : vector<8x384xf32>
    %c0_79 = arith.constant 0 : index
    %c2_80 = arith.constant 2 : index
    %c0_81 = arith.constant 0 : index
    %c0_82 = arith.constant 0 : index
    %88 = vector.load %arg4[%c0_79, %c2_80, %c0_81, %c0_82] : memref<1x4x8x384xf32, #tpu.memory_space<vmem>>, vector<1x1x8x384xf32>
    %89 = vector.shape_cast %88 : vector<1x1x8x384xf32> to vector<8x384xf32>
    %90 = vector.shape_cast %87 : vector<8x384xf32> to vector<1x1x8x384xf32>
    tpu.vector_store %arg4[%c0_79, %c2_80, %c0_81, %c0_82], %90 {strides = array<i32>} : memref<1x4x8x384xf32, #tpu.memory_space<vmem>>, vector<1x1x8x384xf32>,
    %cst_83 = arith.constant 0.000000e+00 : f32
    %91 = vector.broadcast %cst_83 : f32 to vector<8x384xf32>
    %c0_84 = arith.constant 0 : index
    %c0_85 = arith.constant 0 : index
    %c19_86 = arith.constant 19 : index
    %92 = vector.load %arg1[%c0_84, %c0_85, %c19_86] : memref<1x4x512xf32, #tpu.memory_space<vmem>>, vector<1x4x384xf32>
    %93 = vector.shape_cast %92 : vector<1x4x384xf32> to vector<4x384xf32>
    %c12 = arith.constant 12 : index
    %c0_87 = arith.constant 0 : index
    %c0_88 = arith.constant 0 : index
    %94 = vector.load %arg2[%c12, %c0_87, %c0_88] : memref<16x8x4xf32, #tpu.memory_space<vmem>>, vector<1x8x4xf32>
    %95 = vector.shape_cast %94 : vector<1x8x4xf32> to vector<8x4xf32>
    %cst_89 = arith.constant dense<0.000000e+00> : vector<8x384xf32>
    %96 = tpu.matmul %95, %93, %cst_89 {dimension_numbers = #tpu.dot_dimension_numbers<[1], [0], [0], [1], [0, 0, 1, 1], [], []>} : vector<8x4xf32>, vector<4x384xf32>, vector<8x384xf32> -> vector<8x384xf32>
    %97 = arith.addf %91, %96 : vector<8x384xf32>
    %c0_90 = arith.constant 0 : index
    %c0_91 = arith.constant 0 : index
    %c20_92 = arith.constant 20 : index
    %98 = vector.load %arg1[%c0_90, %c0_91, %c20_92] : memref<1x4x512xf32, #tpu.memory_space<vmem>>, vector<1x4x384xf32>
    %99 = vector.shape_cast %98 : vector<1x4x384xf32> to vector<4x384xf32>
    %c13 = arith.constant 13 : index
    %c0_93 = arith.constant 0 : index
    %c0_94 = arith.constant 0 : index
    %100 = vector.load %arg2[%c13, %c0_93, %c0_94] : memref<16x8x4xf32, #tpu.memory_space<vmem>>, vector<1x8x4xf32>
    %101 = vector.shape_cast %100 : vector<1x8x4xf32> to vector<8x4xf32>
    %cst_95 = arith.constant dense<0.000000e+00> : vector<8x384xf32>
    %102 = tpu.matmul %101, %99, %cst_95 {dimension_numbers = #tpu.dot_dimension_numbers<[1], [0], [0], [1], [0, 0, 1, 1], [], []>} : vector<8x4xf32>, vector<4x384xf32>, vector<8x384xf32> -> vector<8x384xf32>
    %103 = arith.addf %97, %102 : vector<8x384xf32>
    %c0_96 = arith.constant 0 : index
    %c0_97 = arith.constant 0 : index
    %c37_98 = arith.constant 37 : index
    %104 = vector.load %arg1[%c0_96, %c0_97, %c37_98] : memref<1x4x512xf32, #tpu.memory_space<vmem>>, vector<1x4x384xf32>
    %105 = vector.shape_cast %104 : vector<1x4x384xf32> to vector<4x384xf32>
    %c14 = arith.constant 14 : index
    %c0_99 = arith.constant 0 : index
    %c0_100 = arith.constant 0 : index
    %106 = vector.load %arg2[%c14, %c0_99, %c0_100] : memref<16x8x4xf32, #tpu.memory_space<vmem>>, vector<1x8x4xf32>
    %107 = vector.shape_cast %106 : vector<1x8x4xf32> to vector<8x4xf32>
    %cst_101 = arith.constant dense<0.000000e+00> : vector<8x384xf32>
    %108 = tpu.matmul %107, %105, %cst_101 {dimension_numbers = #tpu.dot_dimension_numbers<[1], [0], [0], [1], [0, 0, 1, 1], [], []>} : vector<8x4xf32>, vector<4x384xf32>, vector<8x384xf32> -> vector<8x384xf32>
    %109 = arith.addf %103, %108 : vector<8x384xf32>
    %c0_102 = arith.constant 0 : index
    %c0_103 = arith.constant 0 : index
    %c38 = arith.constant 38 : index
    %110 = vector.load %arg1[%c0_102, %c0_103, %c38] : memref<1x4x512xf32, #tpu.memory_space<vmem>>, vector<1x4x384xf32>
    %111 = vector.shape_cast %110 : vector<1x4x384xf32> to vector<4x384xf32>
    %c15 = arith.constant 15 : index
    %c0_104 = arith.constant 0 : index
    %c0_105 = arith.constant 0 : index
    %112 = vector.load %arg2[%c15, %c0_104, %c0_105] : memref<16x8x4xf32, #tpu.memory_space<vmem>>, vector<1x8x4xf32>
    %113 = vector.shape_cast %112 : vector<1x8x4xf32> to vector<8x4xf32>
    %cst_106 = arith.constant dense<0.000000e+00> : vector<8x384xf32>
    %114 = tpu.matmul %113, %111, %cst_106 {dimension_numbers = #tpu.dot_dimension_numbers<[1], [0], [0], [1], [0, 0, 1, 1], [], []>} : vector<8x4xf32>, vector<4x384xf32>, vector<8x384xf32> -> vector<8x384xf32>
    %115 = arith.addf %109, %114 : vector<8x384xf32>
    %116 = vector.broadcast %0 : vector<8x1xf32> to vector<8x384xf32>
    %117 = arith.addf %115, %116 : vector<8x384xf32>
    %c0_107 = arith.constant 0 : index
    %c3_108 = arith.constant 3 : index
    %c0_109 = arith.constant 0 : index
    %c0_110 = arith.constant 0 : index
    %118 = vector.load %arg4[%c0_107, %c3_108, %c0_109, %c0_110] : memref<1x4x8x384xf32, #tpu.memory_space<vmem>>, vector<1x1x8x384xf32>
    %119 = vector.shape_cast %118 : vector<1x1x8x384xf32> to vector<8x384xf32>
    %120 = vector.shape_cast %117 : vector<8x384xf32> to vector<1x1x8x384xf32>
    tpu.vector_store %arg4[%c0_107, %c3_108, %c0_109, %c0_110], %120 {strides = array<i32>} : memref<1x4x8x384xf32, #tpu.memory_space<vmem>>, vector<1x1x8x384xf32>,
    return
  }
  func.func @transform_0(%arg0: i32) -> (i32, i32, i32) {
    %c0_i32 = arith.constant 0 : i32
    %c0_i32_0 = arith.constant 0 : i32
    %c0_i32_1 = arith.constant 0 : i32
    return %arg0, %c0_i32, %c0_i32_0 : i32, i32, i32
  }
  func.func @transform_1(%arg0: i32) -> (i32, i32, i32) {
    %c0_i32 = arith.constant 0 : i32
    %c0_i32_0 = arith.constant 0 : i32
    %c0_i32_1 = arith.constant 0 : i32
    %c0_i32_2 = arith.constant 0 : i32
    return %c0_i32, %c0_i32_0, %c0_i32_1 : i32, i32, i32
  }
  func.func @transform_2(%arg0: i32) -> (i32, i32) {
    %c0_i32 = arith.constant 0 : i32
    %c0_i32_0 = arith.constant 0 : i32
    %c0_i32_1 = arith.constant 0 : i32
    return %c0_i32, %c0_i32_0 : i32, i32
  }
  func.func @transform_3(%arg0: i32) -> (i32, i32, i32, i32) {
    %c0_i32 = arith.constant 0 : i32
    %c0_i32_0 = arith.constant 0 : i32
    %c0_i32_1 = arith.constant 0 : i32
    %c0_i32_2 = arith.constant 0 : i32
    return %arg0, %c0_i32, %c0_i32_0, %c0_i32_1 : i32, i32, i32, i32
  }
}

</mosaic_0001>

<bundles_post_ra>
// kernel: upsample_conv.1
= control target key start
LH: loop header
LB: loop body
LE: loop exit
PB: predicated region body
PF: predicated region fallthrough
CT: control target
= control target key end

     0   :  { %s3279_s12 = smov 0   ;;  %s3699_s0 = inlined_call_operand.vmem [shape: f32[2,4,512], index: 0, kind: input, shape index: {}]   ;;  %s3700_s1 = inlined_call_operand.vmem [shape: f32[16,8,4], index: 1, kind: input, shape index: {}]   ;;  %s3701_s2 = inlined_call_operand.vmem [shape: f32[8,1], index: 2, kind: input, shape index: {}]   ;;  %s3702_s3 = inlined_call_operand.vmem [shape: f32[2,4,8,384], index: 3, kind: output, shape index: {}]  }
   0x1 LB: > { %s2966_s13 = sadd.s32 4294967295, %s3246_s12   ;;  %p2970_p0 = scmp.ge.s32.totalorder %s3246_s12, 1  ;;  %s3246_s12 = sphi %s3279_s12, %s13_s12  }
   0x2   : > { %p137_p1 = scmp.lt.s32.totalorder %s3246_s12, 3 }
   0x4   : > { %p138_p2 = pnand %p2970_p0, %p137_p1 }
   0x5   : > { %p161_p3 = scmp.lt.s32.totalorder (!%p138_p2), %s2966_s13, 1  ;;  %v3248_v0 = vmov (!%p138_p2), 0.0   ;;  %s3249_s18 = smov (!%p138_p2), 127   ;;  %vm3253_vm0 = vmmov (!%p138_p2), 0   ;;  %v3257_v5 = vmov (!%p138_p2), 0   ;;  %v171_v8 = vld [vmem:[%s3701_s2] sm:$0xff] (!%p138_p2) }
   0x6   : > { %141 = sbr.rel (%p138_p2) target bundleno = 467 (0x1d3), region = 32  ;;  %270 = vmatprep.mubr.f32.mxu0 (!%p138_p2), %v3248_v0  ;;  %3113 = vmatprep.subr.mxu1 (!%p138_p2), %v3248_v0  ;;  %s3250_s19 = smov (!%p138_p2), 110   ;;  %vm191_vm1 = vcmask (!%p138_p2), 1039360   ;;  %vm199_vm2 = vcmask (!%p138_p2), 1043456   ;;  %v2974_v15 = vld [vmem:[%s3700_s1 + $0x8] sm:$0xff] (!%p138_p2)  ;;  %vm195_vm3 = vcmask (!%p138_p2), 31744  }
   0x7   : > { %s3251_s20 = smov (!%p138_p2), 109   ;;  %s3252_s21 = smov (!%p138_p2), 126   ;;  %3115 = vmatprep.mubr.msk.f32.mxu1 (!%p138_p2), %vm3253_vm0, %v3248_v0  ;;  %3237 = vset.pattern.permute.xlu0 (!%p138_p2), %v3257_v5  ;;  %vm516_vm4 = vcmask (!%p138_p2), 900096   ;;  %v174_v21 = vld [vmem:[%s3700_s1] sm:$0xff] (!%p138_p2)  ;;  %vm689_vm5 = vcmask (!%p138_p2), 891904   ;;  %v2985_v28 = vld [vmem:[%s3700_s1 + $0x10] sm:$0xff] (!%p138_p2) }
   0x8   : > { %s3254_s22 = smov (!%p138_p2), 108   ;;  %s3255_s23 = smov (!%p138_p2), 92   ;;  %vm875_vm6 = vcmask (!%p138_p2), 1031168   ;;  %v2991_v35 = vld [vmem:[%s3700_s1 + $0x18] sm:$0xff] (!%p138_p2)  ;;  %v2998_v41 = vld [vmem:[%s3700_s1 + $0x28] sm:$0xff] (!%p138_p2)  ;;  %v2997_v50 = vld [vmem:[%s3700_s1 + $0x20] sm:$0xff] (!%p138_p2) }
   0x9   : > { %s3256_s24 = smov (!%p138_p2), 91   ;;  %s3258_s25 = smov (!%p138_p2), 90   ;;  %vm1378_vm7 = vcmask (!%p138_p2), 883712   ;;  %v3009_v58 = vld [vmem:[%s3700_s1 + $0x30] sm:$0xff] (!%p138_p2)  ;;  %vm1890_vm8 = vcmask (!%p138_p2), 752640   ;;  %vm2063_vm9 = vcmask (!%p138_p2), 744448  }
   0xa   : > { %vm2747_vm10 = vcmask (!%p138_p2), 736256  }
   0xd   : > { %s3704_s13 = smov (!%p161_p3, %s2966_s13), 1 }
   0xe   : > { %s3080_s14 = sshll.u32 %s3704_s13, 4  ;;  %s3217_s8 = smul.u32 96, %s3704_s13 }
   0xf   : > { %s3295_s17 = scalar_lea.vmem %s3699_s0, %s3080_s14 }
  0x10   : > { %v3298_v1 = vld [vmem:[%s3295_s17 + $0x8] sm:$0xff]  ;;  %v3301_v2 = vld [vmem:[%s3295_s17] sm:$0xff]  ;;  %s3670_s11 = scalar_lea.vmem %s3702_s3, %s3217_s8 }
  0x11   : > { %187 = vrot.lane.b32.xlu0 %v3298_v1, %s3249_s18  ;;  %183 = vrot.lane.b32.xlu1 %v3301_v2, %s3249_s18  ;;  %v3309_v3 = vcombine.high %v3301_v2, %v3301_v2  ;;  %v182_v4 = vcombine.high %v3298_v1, %v3298_v1  ;;  %v173_v42 = vld [vmem:[%s3295_s17 + $0x8] sm:$0xf] }
  0x15   : > { %512 = vrot.lane.b32.xlu0 %v3298_v1, %s3250_s19  ;;  %508 = vrot.lane.b32.xlu1 %v3301_v2, %s3250_s19 }
  0x19   : > { %510 = vrot.lane.b32.xlu1 %v3309_v3, %s3250_s19  ;;  %185 = vrot.lane.b32.xlu0 %v3309_v3, %s3249_s18 }
  0x1d   : > { %685 = vrot.lane.b32.xlu1 %v3298_v1, %s3251_s20  ;;  %683 = vrot.lane.b32.xlu0 %v3309_v3, %s3251_s20 }
  0x21   : > { %869 = vrot.lane.b32.xlu1 %v3309_v3, %s3252_s21  ;;  %681 = vrot.lane.b32.xlu0 %v3301_v2, %s3251_s20 }
  0x25   : > { %867 = vrot.lane.b32.xlu1 %v3301_v2, %s3252_s21  ;;  %871 = vrot.lane.b32.xlu0 %v3298_v1, %s3252_s21 }
  0x29   : > { %1033 = vrot.lane.b32.xlu1 %v3298_v1, %s3249_s18  ;;  %1031 = vrot.lane.b32.xlu0 %v3309_v3, %s3249_s18 }
  0x2d   : > { %1200 = vrot.lane.b32.xlu1 %v3309_v3, %s3251_s20  ;;  %1029 = vrot.lane.b32.xlu0 %v3301_v2, %s3249_s18 }
  0x31   : > { %1198 = vrot.lane.b32.xlu1 %v3301_v2, %s3251_s20  ;;  %1202 = vrot.lane.b32.xlu0 %v3298_v1, %s3251_s20 }
  0x35   : > { %1372 = vrot.lane.b32.xlu1 %v3309_v3, %s3254_s22  ;;  %189 = vrot.lane.b32.xlu0 %v182_v4, %s3249_s18 }
  0x39   : > { %1370 = vrot.lane.b32.xlu1 %v3301_v2, %s3254_s22  ;;  %1374 = vrot.lane.b32.xlu0 %v3298_v1, %s3254_s22 }
  0x3d   : > { %1554 = vrot.lane.b32.xlu1 %v3309_v3, %s3251_s20  ;;  %514 = vrot.lane.b32.xlu0 %v182_v4, %s3250_s19 }
  0x41   : > { %1552 = vrot.lane.b32.xlu1 %v3301_v2, %s3251_s20  ;;  %1556 = vrot.lane.b32.xlu0 %v3298_v1, %s3251_s20 }
  0x45   : > { %873 = vrot.lane.b32.xlu1 %v182_v4, %s3252_s21  ;;  %687 = vrot.lane.b32.xlu0 %v182_v4, %s3251_s20 }
  0x49   : > { %1717 = vrot.lane.b32.xlu1 %v3298_v1, %s3250_s19  ;;  %1715 = vrot.lane.b32.xlu0 %v3309_v3, %s3250_s19 }
  0x4d   : > { %1035 = vrot.lane.b32.xlu1 %v182_v4, %s3249_s18  ;;  %1713 = vrot.lane.b32.xlu0 %v3301_v2, %s3250_s19 }
  0x51   : > { %1884 = vrot.lane.b32.xlu1 %v3309_v3, %s3255_s23  ;;  %1204 = vrot.lane.b32.xlu0 %v182_v4, %s3251_s20 }
  0x55   : > { %1882 = vrot.lane.b32.xlu1 %v3301_v2, %s3255_s23  ;;  %1886 = vrot.lane.b32.xlu0 %v3298_v1, %s3255_s23 }
  0x59   : > { %1558 = vrot.lane.b32.xlu1 %v182_v4, %s3251_s20  ;;  %1376 = vrot.lane.b32.xlu0 %v182_v4, %s3254_s22 }
  0x5d   : > { %2059 = vrot.lane.b32.xlu1 %v3298_v1, %s3256_s24  ;;  %2057 = vrot.lane.b32.xlu0 %v3309_v3, %s3256_s24 }
  0x61   : > { %1719 = vrot.lane.b32.xlu1 %v182_v4, %s3250_s19  ;;  %2055 = vrot.lane.b32.xlu0 %v3301_v2, %s3256_s24 }
  0x65   : > { %2241 = vrot.lane.b32.xlu1 %v3298_v1, %s3254_s22  ;;  %2239 = vrot.lane.b32.xlu0 %v3309_v3, %s3254_s22 }
  0x69   : > { %1888 = vrot.lane.b32.xlu1 %v182_v4, %s3255_s23  ;;  %2237 = vrot.lane.b32.xlu0 %v3301_v2, %s3254_s22 }
  0x6d   : > { %2400 = vrot.lane.b32.xlu1 %v3309_v3, %s3251_s20  ;;  %2061 = vrot.lane.b32.xlu0 %v182_v4, %s3256_s24 }
  0x71   : > { %2398 = vrot.lane.b32.xlu1 %v3301_v2, %s3251_s20  ;;  %2402 = vrot.lane.b32.xlu0 %v3298_v1, %s3251_s20 }
  0x75   : > { %2404 = vrot.lane.b32.xlu1 %v182_v4, %s3251_s20  ;;  %2243 = vrot.lane.b32.xlu0 %v182_v4, %s3254_s22 }
  0x79   : > { %2571 = vrot.lane.b32.xlu1 %v3298_v1, %s3256_s24  ;;  %2569 = vrot.lane.b32.xlu0 %v3309_v3, %s3256_s24 }
  0x7d   : > { %2573 = vrot.lane.b32.xlu1 %v182_v4, %s3256_s24  ;;  %2567 = vrot.lane.b32.xlu0 %v3301_v2, %s3256_s24 }
  0x81   : > { %2743 = vrot.lane.b32.xlu1 %v3298_v1, %s3258_s25  ;;  %2741 = vrot.lane.b32.xlu0 %v3309_v3, %s3258_s25 }
  0x83   : > { %v188_v6 = vpop.permute.xlu0 %187  ;;  %v184_v7 = vpop.permute.xlu1 %183 }
  0x85   : > { %2739 = vrot.lane.b32.xlu1 %v3301_v2, %s3258_s25  ;;  %2745 = vrot.lane.b32.xlu0 %v182_v4, %s3258_s25  ;;  %v3015_v4 = vld [vmem:[%s3700_s1 + $0x38] sm:$0xff] }
  0x87   : > { %v3399_v9 = vpop.permute.xlu0 %512  ;;  %v509_v10 = vpop.permute.xlu1 %508 }
  0x89   : > { %848 = vperm.xlu0 %3237, %v171_v8  }
  0x8b   : > { %v511_v11 = vpop.permute.xlu1 %510  ;;  %v186_v12 = vpop.permute.xlu0 %185 }
  0x8c   : > { %v193_v13 = vsel %vm191_vm1, %v186_v12, %v188_v6  ;;  %v192_v14 = vsel %vm191_vm1, %v184_v7, %v186_v12  ;;  %v518_v18 = vsel %vm516_vm4, %v511_v11, %v3399_v9  ;;  %v517_v22 = vsel %vm516_vm4, %v509_v10, %v511_v11  ;;  %v3025_v10 = vld [vmem:[%s3700_s1 + $0x48] sm:$0xff] }
  0x8d   : > { %2975 = vmatprep.subr.msk.mxu0 %vm199_vm2, %v193_v13 }
  0x8e   : > { %2976 = vmatpush1.msk.msra.mxu0 %vm199_vm2, %v192_v14 }
  0x8f   : > { %v3408_v16 = vpop.permute.xlu1 %685  ;;  %2977 = vmatmul.mubr.msk.f32.vlgmr.msra.gmra.mrb[0].mxu0 %vm195_vm3, %v2974_v15  ;;  %v684_v17 = vpop.permute.xlu0 %683  ;;  %2980 = vmatprep.subr.msk.mxu0 %vm199_vm2, %v3309_v3 }
  0x90   : > { %2981 = vmatpush1.msk.msra.mxu0 %vm199_vm2, %v3301_v2  ;;  %423 = vmatprep.mubr.f32.mxu0 %v3248_v0  ;;  %v691_v25 = vsel %vm689_vm5, %v684_v17, %v3408_v16 }
  0x91   : > { %2986 = vmatprep.subr.msk.mxu0 %vm199_vm2, %v518_v18  ;;  %v3024_v18 = vld [vmem:[%s3700_s1 + $0x40] sm:$0xff] }
  0x93   : > { %v870_v19 = vpop.permute.xlu1 %869  ;;  %v682_v20 = vpop.permute.xlu0 %681 }
  0x94   : > { %v690_v29 = vsel %vm689_vm5, %v682_v20, %v684_v17 }
  0x97   : > { %v868_v23 = vpop.permute.xlu1 %867  ;;  %v3423_v24 = vpop.permute.xlu0 %871  ;;  %2982 = vmatmul.mubr.msk.f32.vlgmr.msra.gmra.mrb[0].mxu0 %vm195_vm3, %v174_v21 }
  0x98   : > { %2987 = vmatpush1.msk.msra.mxu0 %vm199_vm2, %v517_v22  ;;  %593 = vmatprep.mubr.f32.mxu0 %v3248_v0  ;;  %v877_v32 = vsel %vm875_vm6, %v870_v19, %v3423_v24  ;;  %v876_v36 = vsel %vm875_vm6, %v868_v23, %v870_v19 }
  0x99   : > { %2992 = vmatprep.subr.msk.mxu0 %vm199_vm2, %v691_v25 }
  0x9b   : > { %v3431_v26 = vpop.permute.xlu1 %1033  ;;  %v1032_v27 = vpop.permute.xlu0 %1031 }
  0x9c   : > { %v1038_v39 = vsel %vm191_vm1, %v1032_v27, %v3431_v26 }
  0x9f   : > { %v1201_v30 = vpop.permute.xlu1 %1200  ;;  %v1030_v31 = vpop.permute.xlu0 %1029  ;;  %2988 = vmatmul.mubr.msk.f32.vlgmr.msra.gmra.mrb[0].mxu0 %vm195_vm3, %v2985_v28 }
  0xa0   : > { %2993 = vmatpush1.msk.msra.mxu0 %vm199_vm2, %v690_v29  ;;  %766 = vmatprep.mubr.f32.mxu0 %v3248_v0  ;;  %v1037_v43 = vsel %vm191_vm1, %v1030_v31, %v1032_v27  ;;  %v3036_v27 = vld [vmem:[%s3700_s1 + $0x50] sm:$0xff] }
  0xa1   : > { %2999 = vmatprep.subr.msk.mxu0 %vm199_vm2, %v877_v32 }
  0xa3   : > { %v1199_v33 = vpop.permute.xlu1 %1198  ;;  %v3443_v34 = vpop.permute.xlu0 %1202 }
  0xa4   : > { %v1207_v46 = vsel %vm689_vm5, %v1201_v30, %v3443_v34  ;;  %v1206_v51 = vsel %vm689_vm5, %v1199_v33, %v1201_v30 }
  0xa7   : > { %v1373_v37 = vpop.permute.xlu1 %1372  ;;  %v190_v38 = vpop.permute.xlu0 %189  ;;  %2994 = vmatmul.mubr.msk.f32.vlgmr.msra.gmra.mrb[0].mxu0 %vm195_vm3, %v2991_v35 }
  0xa8   : > { %3000 = vmatpush1.msk.msra.mxu0 %vm199_vm2, %v876_v36  ;;  %v194_v40 = vsel %vm191_vm1, %v188_v6, %v190_v38  ;;  %952 = vmatprep.mubr.f32.mxu0 %v3248_v0 }
  0xa9   : > { %3004 = vmatprep.subr.msk.mxu0 %vm199_vm2, %v1038_v39  ;;  %3114 = vmatpush3.msk.msra.mxu1 %vm199_vm2, %v194_v40  ;;  %v3052_v40 = vld [vmem:[%s3700_s1 + $0x68] sm:$0xff] }
  0xaa   : > { %3116 = vmatmul.mubr.msk.f32.vlgmr.msra.gmra.mrb[0].mxu1 %vm195_vm3, %v2974_v15  ;;  %3118 = vmatprep.subr.mxu1 %v3248_v0 }
  0xab   : > { %v1371_v44 = vpop.permute.xlu1 %1370  ;;  %v3464_v45 = vpop.permute.xlu0 %1374  ;;  %3001 = vmatmul.mubr.msk.f32.vlgmr.msra.gmra.mrb[2].mxu0 %vm195_vm3, %v2998_v41  ;;  %3119 = vmatpush3.msk.msra.mxu1 %vm199_vm2, %v173_v42 }
  0xac   : > { %3005 = vmatpush1.msk.msra.mxu0 %vm199_vm2, %v1037_v43  ;;  %3120 = vmatprep.mubr.msk.f32.mxu1 %vm3253_vm0, %v3248_v0  ;;  %v1380_v54 = vsel %vm1378_vm7, %v1373_v37, %v3464_v45  ;;  %v1379_v60 = vsel %vm1378_vm7, %v1371_v44, %v1373_v37 }
  0xad   : > { %3010 = vmatprep.subr.msk.mxu0 %vm199_vm2, %v1207_v46  ;;  %3123 = vmatprep.subr.mxu1 %v3248_v0 }
  0xae   : > { %3121 = vmatmul.mubr.msk.f32.vlgmr.msra.gmra.mrb[2].mxu1 %vm195_vm3, %v174_v21  ;;  %1113 = vmatprep.mubr.f32.mxu0 %v3248_v0 }
  0xaf   : > { %v1555_v47 = vpop.permute.xlu1 %1554  ;;  %v515_v48 = vpop.permute.xlu0 %514  ;;  %3125 = vmatprep.mubr.msk.f32.mxu1 %vm3253_vm0, %v3248_v0 }
  0xb0   : > { %v519_v49 = vsel %vm516_vm4, %v3399_v9, %v515_v48  ;;  %v3051_v48 = vld [vmem:[%s3700_s1 + $0x60] sm:$0xff] }
  0xb1   : > { %3124 = vmatpush3.msk.msra.mxu1 %vm199_vm2, %v519_v49 }
  0xb2   : > { %3126 = vmatmul.mubr.msk.f32.vlgmr.msra.gmra.mrb[4].mxu1 %vm195_vm3, %v2985_v28  ;;  %3128 = vmatprep.subr.mxu1 %v3248_v0 }
  0xb3   : > { %v1553_v52 = vpop.permute.xlu1 %1552  ;;  %v3488_v53 = vpop.permute.xlu0 %1556  ;;  %3006 = vmatmul.mubr.msk.f32.vlgmr.msra.gmra.mrb[2].mxu0 %vm195_vm3, %v2997_v50  ;;  %3130 = vmatprep.mubr.msk.f32.mxu1 %vm3253_vm0, %v3248_v0 }
  0xb4   : > { %3011 = vmatpush1.msk.msra.mxu0 %vm199_vm2, %v1206_v51  ;;  %1282 = vmatprep.mubr.f32.mxu0 %v3248_v0  ;;  %v1561_v63 = vsel %vm689_vm5, %v1555_v47, %v3488_v53  ;;  %v1560_v5 = vsel %vm689_vm5, %v1553_v52, %v1555_v47 }
  0xb5   : > { %3016 = vmatprep.subr.msk.mxu0 %vm199_vm2, %v1380_v54 }
  0xb7   : > { %v874_v55 = vpop.permute.xlu1 %873  ;;  %v688_v56 = vpop.permute.xlu0 %687 }
  0xb8   : > { %v692_v57 = vsel %vm689_vm5, %v3408_v16, %v688_v56  ;;  %v878_v59 = vsel %vm875_vm6, %v3423_v24, %v874_v55  ;;  %v3063_v55 = vld [vmem:[%s3700_s1 + $0x70] sm:$0xff] }
  0xb9   : > { %3129 = vmatpush3.msk.msra.mxu1 %vm199_vm2, %v692_v57 }
  0xba   : > { %3133 = vmatprep.subr.mxu1 %v3248_v0  ;;  %3131 = vmatmul.mubr.msk.f32.vlgmr.msra.gmra.mrb[6].mxu1 %vm195_vm3, %v2991_v35  ;;  %v3042_v35 = vld [vmem:[%s3700_s1 + $0x58] sm:$0xff] }
  0xbb   : > { %v3509_v61 = vpop.permute.xlu1 %1717  ;;  %v1716_v62 = vpop.permute.xlu0 %1715  ;;  %3134 = vmatpush3.msk.msra.mxu1 %vm199_vm2, %v878_v59  ;;  %3012 = vmatmul.mubr.msk.f32.vlgmr.msra.gmra.mrb[2].mxu0 %vm195_vm3, %v3009_v58 }
  0xbc   : > { %3017 = vmatpush1.msk.msra.mxu0 %vm199_vm2, %v1379_v60  ;;  %3135 = vmatprep.mubr.msk.f32.mxu1 %vm3253_vm0, %v3248_v0  ;;  %v1722_v8 = vsel %vm516_vm4, %v1716_v62, %v3509_v61 }
  0xbd   : > { %3026 = vmatprep.subr.msk.mxu0 %vm199_vm2, %v1561_v63  ;;  %3138 = vmatprep.subr.mxu1 %v3248_v0  ;;  %v3069_v63 = vld [vmem:[%s3700_s1 + $0x78] sm:$0xff] }
  0xbe   : > { %3136 = vmatmul.mubr.msk.f32.vlgmr.msra.gmra.mrb[8].mxu1 %vm195_vm3, %v2998_v41  ;;  %1455 = vmatprep.mubr.f32.mxu0 %v3248_v0 }
  0xbf   : > { %v1036_v1 = vpop.permute.xlu1 %1035  ;;  %v1714_v2 = vpop.permute.xlu0 %1713  ;;  %3140 = vmatprep.mubr.msk.f32.mxu1 %vm3253_vm0, %v3248_v0 }
  0xc0   : > { %v1039_v3 = vsel %vm191_vm1, %v3431_v26, %v1036_v1  ;;  %v1721_v11 = vsel %vm516_vm4, %v1714_v2, %v1716_v62 }
  0xc1   : > { %3139 = vmatpush3.msk.msra.mxu1 %vm199_vm2, %v1039_v3 }
  0xc2   : > { %3143 = vmatprep.subr.mxu1 %v3248_v0  ;;  %3141 = vmatmul.mubr.msk.f32.vlgmr.msra.gmra.mrb[10].mxu1 %vm195_vm3, %v2997_v50 }
  0xc3   : > { %v1885_v6 = vpop.permute.xlu1 %1884  ;;  %v1205_v7 = vpop.permute.xlu0 %1204  ;;  %3018 = vmatmul.mubr.msk.f32.vlgmr.msra.gmra.mrb[2].mxu0 %vm195_vm3, %v3015_v4  ;;  %3145 = vmatprep.mubr.msk.f32.mxu1 %vm3253_vm0, %v3248_v0 }
  0xc4   : > { %v1208_v9 = vsel %vm689_vm5, %v3443_v34, %v1205_v7  ;;  %3027 = vmatpush1.msk.msra.mxu0 %vm199_vm2, %v1560_v5  ;;  %1636 = vmatprep.mubr.f32.mxu0 %v3248_v0 }
  0xc5   : > { %3031 = vmatprep.subr.msk.mxu0 %vm199_vm2, %v1722_v8  ;;  %3144 = vmatpush3.msk.msra.mxu1 %vm199_vm2, %v1208_v9 }
  0xc6   : > { %3146 = vmatmul.mubr.msk.f32.vlgmr.msra.gmra.mrb[12].mxu1 %vm195_vm3, %v3009_v58  ;;  %3148 = vmatprep.subr.mxu1 %v3248_v0 }
  0xc7   : > { %v1883_v12 = vpop.permute.xlu1 %1882  ;;  %v1887_v13 = vpop.permute.xlu0 %1886  ;;  %3028 = vmatmul.mubr.msk.f32.vlgmr.msra.gmra.mrb[4].mxu0 %vm195_vm3, %v3025_v10  ;;  %3150 = vmatprep.mubr.msk.f32.mxu1 %vm3253_vm0, %v3248_v0 }
  0xc8   : > { %v1892_v14 = vsel %vm1890_vm8, %v1885_v6, %v1887_v13  ;;  %3032 = vmatpush1.msk.msra.mxu0 %vm199_vm2, %v1721_v11  ;;  %1797 = vmatprep.mubr.f32.mxu0 %v3248_v0  ;;  %v1891_v20 = vsel %vm1890_vm8, %v1883_v12, %v1885_v6 }
  0xc9   : > { %3037 = vmatprep.subr.msk.mxu0 %vm199_vm2, %v1892_v14 }
  0xcb   : > { %v1559_v15 = vpop.permute.xlu1 %1558  ;;  %v1377_v16 = vpop.permute.xlu0 %1376 }
  0xcc   : > { %v1381_v17 = vsel %vm1378_vm7, %v3464_v45, %v1377_v16  ;;  %v1562_v19 = vsel %vm689_vm5, %v3488_v53, %v1559_v15 }
  0xcd   : > { %3149 = vmatpush3.msk.msra.mxu1 %vm199_vm2, %v1381_v17 }
  0xce   : > { %3153 = vmatprep.subr.mxu1 %v3248_v0  ;;  %3151 = vmatmul.mubr.msk.f32.vlgmr.msra.gmra.mrb[14].mxu1 %vm195_vm3, %v3015_v4 }
  0xcf   : > { %v2060_v21 = vpop.permute.xlu1 %2059  ;;  %v2058_v22 = vpop.permute.xlu0 %2057  ;;  %3154 = vmatpush3.msk.msra.mxu1 %vm199_vm2, %v1562_v19  ;;  %3033 = vmatmul.mubr.msk.f32.vlgmr.msra.gmra.mrb[4].mxu0 %vm195_vm3, %v3024_v18 }
  0xd0   : > { %v2065_v23 = vsel %vm2063_vm9, %v2058_v22, %v2060_v21  ;;  %3038 = vmatpush1.msk.msra.mxu0 %vm199_vm2, %v1891_v20  ;;  %3155 = vmatprep.mubr.msk.f32.mxu1 %vm3253_vm0, %v3248_v0 }
  0xd1   : > { %3043 = vmatprep.subr.msk.mxu0 %vm199_vm2, %v2065_v23  ;;  %3158 = vmatprep.subr.mxu1 %v3248_v0 }
  0xd2   : > { %3156 = vmatmul.mubr.msk.f32.vlgmr.msra.gmra.mrb[16].mxu1 %vm195_vm3, %v3025_v10  ;;  %1967 = vmatprep.mubr.f32.mxu0 %v3248_v0 }
  0xd3   : > { %v1720_v24 = vpop.permute.xlu1 %1719  ;;  %v2056_v25 = vpop.permute.xlu0 %2055  ;;  %3160 = vmatprep.mubr.msk.f32.mxu1 %vm3253_vm0, %v3248_v0 }
  0xd4   : > { %v1723_v26 = vsel %vm516_vm4, %v3509_v61, %v1720_v24  ;;  %v2064_v28 = vsel %vm2063_vm9, %v2056_v25, %v2058_v22 }
  0xd5   : > { %3159 = vmatpush3.msk.msra.mxu1 %vm199_vm2, %v1723_v26 }
  0xd6   : > { %3163 = vmatprep.subr.mxu1 %v3248_v0  ;;  %3161 = vmatmul.mubr.msk.f32.vlgmr.msra.gmra.mrb[18].mxu1 %vm195_vm3, %v3024_v18 }
  0xd7   : > { %v2242_v29 = vpop.permute.xlu1 %2241  ;;  %v2240_v30 = vpop.permute.xlu0 %2239  ;;  %3039 = vmatmul.mubr.msk.f32.vlgmr.msra.gmra.mrb[4].mxu0 %vm195_vm3, %v3036_v27  ;;  %3165 = vmatprep.mubr.msk.f32.mxu1 %vm3253_vm0, %v3248_v0 }
  0xd8   : > { %v2246_v31 = vsel %vm1378_vm7, %v2240_v30, %v2242_v29  ;;  %3044 = vmatpush1.msk.msra.mxu0 %vm199_vm2, %v2064_v28  ;;  %2140 = vmatprep.mubr.f32.mxu0 %v3248_v0 }
  0xd9   : > { %3053 = vmatprep.subr.msk.mxu0 %vm199_vm2, %v2246_v31 }
  0xdb   : > { %v1889_v32 = vpop.permute.xlu1 %1888  ;;  %v2238_v33 = vpop.permute.xlu0 %2237 }
  0xdc   : > { %v1893_v34 = vsel %vm1890_vm8, %v1887_v13, %v1889_v32  ;;  %v2245_v36 = vsel %vm1378_vm7, %v2238_v33, %v2240_v30 }
  0xdd   : > { %3164 = vmatpush3.msk.msra.mxu1 %vm199_vm2, %v1893_v34 }
  0xde   : > { %3168 = vmatprep.subr.mxu1 %v3248_v0  ;;  %3166 = vmatmul.mubr.msk.f32.vlgmr.msra.gmra.mrb[20].mxu1 %vm195_vm3, %v3036_v27 }
  0xdf   : > { %v2401_v37 = vpop.permute.xlu1 %2400  ;;  %v2062_v38 = vpop.permute.xlu0 %2061  ;;  %3045 = vmatmul.mubr.msk.f32.vlgmr.msra.gmra.mrb[4].mxu0 %vm195_vm3, %v3042_v35  ;;  %3170 = vmatprep.mubr.msk.f32.mxu1 %vm3253_vm0, %v3248_v0 }
  0xe0   : > { %v2066_v39 = vsel %vm2063_vm9, %v2060_v21, %v2062_v38  ;;  %3054 = vmatpush1.msk.msra.mxu0 %vm199_vm2, %v2245_v36  ;;  %2321 = vmatprep.mubr.f32.mxu0 %v3248_v0 }
  0xe1   : > { %3169 = vmatpush3.msk.msra.mxu1 %vm199_vm2, %v2066_v39 }
  0xe2   : > { %3171 = vmatmul.mubr.msk.f32.vlgmr.msra.gmra.mrb[22].mxu1 %vm195_vm3, %v3042_v35  ;;  %3173 = vmatprep.subr.mxu1 %v3248_v0 }
  0xe3   : > { %v2399_v41 = vpop.permute.xlu1 %2398  ;;  %v2403_v42 = vpop.permute.xlu0 %2402  ;;  %3055 = vmatmul.mubr.msk.f32.vlgmr.msra.gmra.mrb[6].mxu0 %vm195_vm3, %v3052_v40  ;;  %3175 = vmatprep.mubr.msk.f32.mxu1 %vm3253_vm0, %v3248_v0 }
  0xe4   : > { %v2406_v43 = vsel %vm689_vm5, %v2399_v41, %v2401_v37  ;;  %v2407_v44 = vsel %vm689_vm5, %v2401_v37, %v2403_v42  ;;  %2482 = vmatprep.mubr.f32.mxu0 %v3248_v0 }
  0xe5   : > { %3058 = vmatprep.subr.msk.mxu0 %vm199_vm2, %v2407_v44 }
  0xe6   : > { %3059 = vmatpush1.msk.msra.mxu0 %vm199_vm2, %v2406_v43 }
  0xe7   : > { %v2405_v45 = vpop.permute.xlu1 %2404  ;;  %v2244_v46 = vpop.permute.xlu0 %2243 }
  0xe8   : > { %v2247_v47 = vsel %vm1378_vm7, %v2242_v29, %v2244_v46  ;;  %v2408_v49 = vsel %vm689_vm5, %v2403_v42, %v2405_v45 }
  0xe9   : > { %3174 = vmatpush3.msk.msra.mxu1 %vm199_vm2, %v2247_v47 }
  0xea   : > { %3178 = vmatprep.subr.mxu1 %v3248_v0  ;;  %3176 = vmatmul.mubr.msk.f32.vlgmr.msra.gmra.mrb[24].mxu1 %vm195_vm3, %v3052_v40 }
  0xeb   : > { %v2572_v50 = vpop.permute.xlu1 %2571  ;;  %v2570_v51 = vpop.permute.xlu0 %2569  ;;  %3060 = vmatmul.mubr.msk.f32.vlgmr.msra.gmra.mrb[6].mxu0 %vm195_vm3, %v3051_v48  ;;  %3179 = vmatpush3.msk.msra.mxu1 %vm199_vm2, %v2408_v49 }
  0xec   : > { %v2576_v52 = vsel %vm2063_vm9, %v2570_v51, %v2572_v50  ;;  %3180 = vmatprep.mubr.msk.f32.mxu1 %vm3253_vm0, %v3248_v0  ;;  %3183 = vmatprep.subr.mxu1 %v3248_v0 }
  0xed   : > { %3064 = vmatprep.subr.msk.mxu0 %vm199_vm2, %v2576_v52  ;;  %2651 = vmatprep.mubr.f32.mxu0 %v3248_v0 }
  0xee   : > { %3181 = vmatmul.mubr.msk.f32.vlgmr.msra.gmra.mrb[26].mxu1 %vm195_vm3, %v3051_v48 }
  0xef   : > { %v2574_v53 = vpop.permute.xlu1 %2573  ;;  %v2568_v54 = vpop.permute.xlu0 %2567  ;;  %3185 = vmatprep.mubr.msk.f32.mxu1 %vm3253_vm0, %v3248_v0 }
  0xf0   : > { %v2577_v56 = vsel %vm2063_vm9, %v2572_v50, %v2574_v53  ;;  %v2575_v57 = vsel %vm2063_vm9, %v2568_v54, %v2570_v51 }
  0xf1   : > { %3065 = vmatpush1.msk.msra.mxu0 %vm199_vm2, %v2575_v57  ;;  %3184 = vmatpush3.msk.msra.mxu1 %vm199_vm2, %v2577_v56 }
  0xf2   : > { %3186 = vmatmul.mubr.msk.f32.vlgmr.msra.gmra.mrb[28].mxu1 %vm195_vm3, %v3063_v55  ;;  %3188 = vmatprep.subr.mxu1 %v3248_v0 }
  0xf3   : > { %v2744_v58 = vpop.permute.xlu1 %2743  ;;  %v2742_v59 = vpop.permute.xlu0 %2741  ;;  %3066 = vmatmul.mubr.msk.f32.vlgmr.msra.gmra.mrb[6].mxu0 %vm195_vm3, %v3063_v55  ;;  %3190 = vmatprep.mubr.msk.f32.mxu1 %vm3253_vm0, %v3248_v0 }
  0xf4   : > { %v2749_v60 = vsel %vm2747_vm10, %v2742_v59, %v2744_v58  ;;  %2824 = vmatprep.mubr.f32.mxu0 %v3248_v0 }
  0xf5   : > { %3070 = vmatprep.subr.msk.mxu0 %vm199_vm2, %v2749_v60 }
  0xf7   : > { %v2740_v61 = vpop.permute.xlu1 %2739  ;;  %v2746_v62 = vpop.permute.xlu0 %2745 }
  0xf8   : > { %v2748_v1 = vsel %vm2747_vm10, %v2740_v61, %v2742_v59  ;;  %v2750_v2 = vsel %vm2747_vm10, %v2744_v58, %v2746_v62 }
  0xf9   : > { %3071 = vmatpush1.msk.msra.mxu0 %vm199_vm2, %v2748_v1  ;;  %3189 = vmatpush3.msk.msra.mxu1 %vm199_vm2, %v2750_v2 }
  0xfa   : > { %3191 = vmatmul.mubr.msk.f32.vlgmr.msra.gmra.mrb[30].mxu1 %vm195_vm3, %v3069_v63 }
  0xfb   : > { %3072 = vmatmul.mubr.msk.f32.vlgmr.msra.gmra.mrb[6].mxu0 %vm195_vm3, %v3069_v63 }
 0x108   : > { %v3665_v0 = vpop.permute.xlu0 %848 }
 0x17a   : > { %v768_v3 = vpop.f32.mrb[0].mxu0 }
 0x17b   : > { %v851_v4 = vadd.f32 %v3665_v0, %v768_v3  ;;  %v770_v5 = vpop.f32.mrb[1].mxu0 }
 0x17c   : > { %v852_v6 = vadd.f32 %v3665_v0, %v770_v5 }
 0x17d   : > { %854 = vst [vmem:[%s3670_s11] sm:$0xff] %v851_v4  ;;  %v343_v7 = vpop.f32.mrb[0].mxu1 }
 0x17e   : > { %855 = vst [vmem:[%s3670_s11 + $0x8] sm:$0xff] %v852_v6  ;;  %v3117_v8 = vpop.f32.mrb[1].mxu1 }
 0x181   : > { %v496_v9 = vpop.f32.mrb[2].mxu1 }
 0x182   : > { %v497_v10 = vadd.f32 %v496_v9, %v343_v7  ;;  %v3122_v11 = vpop.f32.mrb[3].mxu1 }
 0x185   : > { %v666_v12 = vpop.f32.mrb[4].mxu1 }
 0x186   : > { %v672_v13 = vadd.f32 %v666_v12, %v497_v10  ;;  %v3127_v14 = vpop.f32.mrb[5].mxu1 }
 0x18d   : > { %v839_v15 = vpop.f32.mrb[6].mxu1 }
 0x18e   : > { %v845_v16 = vadd.f32 %v839_v15, %v672_v13  ;;  %v3132_v17 = vpop.f32.mrb[7].mxu1 }
 0x190   : > { %v853_v18 = vadd.f32 %v3665_v0, %v845_v16 }
 0x191   : > { %v1025_v19 = vpop.f32.mrb[8].mxu1 }
 0x192   : > { %856 = vst [vmem:[%s3670_s11 + $0x10] sm:$0xff] %v853_v18  ;;  %v3137_v20 = vpop.f32.mrb[9].mxu1 }
 0x195   : > { %v1186_v21 = vpop.f32.mrb[10].mxu1 }
 0x196   : > { %v1457_v22 = vpop.f32.mrb[2].mxu0  ;;  %v1187_v23 = vadd.f32 %v1186_v21, %v1025_v19  ;;  %v3142_v24 = vpop.f32.mrb[11].mxu1 }
 0x197   : > { %v1535_v25 = vadd.f32 %v1457_v22, %v3665_v0  ;;  %v1459_v26 = vpop.f32.mrb[3].mxu0 }
 0x198   : > { %v1536_v27 = vadd.f32 %v1459_v26, %v3665_v0 }
 0x199   : > { %3021 = vst [vmem:[%s3670_s11 + $0x18] sm:$0xff] %v1535_v25  ;;  %v1355_v28 = vpop.f32.mrb[12].mxu1 }
 0x19a   : > { %3022 = vst [vmem:[%s3670_s11 + $0x20] sm:$0xff] %v1536_v27  ;;  %v1361_v29 = vadd.f32 %v1355_v28, %v1187_v23  ;;  %v3147_v30 = vpop.f32.mrb[13].mxu1 }
 0x1a1   : > { %v1528_v31 = vpop.f32.mrb[14].mxu1 }
 0x1a2   : > { %v1534_v32 = vadd.f32 %v1528_v31, %v1361_v29  ;;  %v3152_v33 = vpop.f32.mrb[15].mxu1 }
 0x1a4   : > { %v1537_v34 = vadd.f32 %v1534_v32, %v3665_v0 }
 0x1a5   : > { %v1709_v35 = vpop.f32.mrb[16].mxu1 }
 0x1a6   : > { %3023 = vst [vmem:[%s3670_s11 + $0x28] sm:$0xff] %v1537_v34  ;;  %v3157_v36 = vpop.f32.mrb[17].mxu1 }
 0x1a9   : > { %v1870_v37 = vpop.f32.mrb[18].mxu1 }
 0x1aa   : > { %v1871_v38 = vadd.f32 %v1870_v37, %v1709_v35  ;;  %v3162_v39 = vpop.f32.mrb[19].mxu1 }
 0x1b1   : > { %v2040_v40 = vpop.f32.mrb[20].mxu1 }
 0x1b2   : > { %v2142_v41 = vpop.f32.mrb[4].mxu0  ;;  %v2046_v42 = vadd.f32 %v2040_v40, %v1871_v38  ;;  %v3167_v43 = vpop.f32.mrb[21].mxu1 }
 0x1b3   : > { %v2220_v44 = vadd.f32 %v2142_v41, %v3665_v0  ;;  %v2144_v45 = vpop.f32.mrb[5].mxu0 }
 0x1b4   : > { %v2221_v46 = vadd.f32 %v2144_v45, %v3665_v0 }
 0x1b5   : > { %3048 = vst [vmem:[%s3670_s11 + $0x30] sm:$0xff] %v2220_v44  ;;  %v2213_v47 = vpop.f32.mrb[22].mxu1 }
 0x1b6   : > { %3049 = vst [vmem:[%s3670_s11 + $0x38] sm:$0xff] %v2221_v46  ;;  %v2219_v48 = vadd.f32 %v2213_v47, %v2046_v42  ;;  %v3172_v49 = vpop.f32.mrb[23].mxu1 }
 0x1b8   : > { %v2222_v50 = vadd.f32 %v2219_v48, %v3665_v0 }
 0x1ba   : > { %3050 = vst [vmem:[%s3670_s11 + $0x40] sm:$0xff] %v2222_v50 }
 0x1bd   : > { %v2394_v51 = vpop.f32.mrb[24].mxu1 }
 0x1be   : > { %v3177_v52 = vpop.f32.mrb[25].mxu1 }
 0x1c1   : > { %v2555_v53 = vpop.f32.mrb[26].mxu1 }
 0x1c2   : > { %v2556_v54 = vadd.f32 %v2555_v53, %v2394_v51  ;;  %v3182_v55 = vpop.f32.mrb[27].mxu1 }
 0x1c5   : > { %v2724_v56 = vpop.f32.mrb[28].mxu1 }
 0x1c6   : > { %v2730_v57 = vadd.f32 %v2724_v56, %v2556_v54  ;;  %v3187_v58 = vpop.f32.mrb[29].mxu1 }
 0x1cd   : > { %v2897_v59 = vpop.f32.mrb[30].mxu1 }
 0x1ce   : > { %v2903_v60 = vadd.f32 %v2897_v59, %v2730_v57  ;;  %v2826_v61 = vpop.f32.mrb[6].mxu0  ;;  %v3192_v62 = vpop.f32.mrb[31].mxu1 }
 0x1cf   : > { %v2904_v63 = vadd.f32 %v2826_v61, %v3665_v0  ;;  %v2828_v1 = vpop.f32.mrb[7].mxu0 }
 0x1d0   : > { %v2906_v2 = vadd.f32 %v2903_v60, %v3665_v0  ;;  %v2905_v3 = vadd.f32 %v2828_v1, %v3665_v0 }
 0x1d1   : > { %3075 = vst [vmem:[%s3670_s11 + $0x48] sm:$0xff] %v2904_v63 }
 0x1d2   : > { %3077 = vst [vmem:[%s3670_s11 + $0x58] sm:$0xff] %v2906_v2  ;;  %3076 = vst [vmem:[%s3670_s11 + $0x50] sm:$0xff] %v2905_v3 }
 0x1d3 PF: > { %s13_s12 = sadd.s32 1, %s3246_s12  }
 0x1d4   : > { %p10_p4 = scmp.ge.s32.totalorder %s13_s12, 4  }
 0x1d6   :  { %12 = sbr.rel (!%p10_p4) target bundleno = 1 (0x1), region = 80 }

</bundles_post_ra>
